<compile_context>
chip_gen: v5e
topology: v5e:2x2
jax: 0.10.0
libtpu: 0.0.40
codegen_flags: <defaults>
</compile_context>

<pallas_src>
import jax
import jax.numpy as jnp
from jax import lax
from jax.experimental import pallas as pl
from jax.experimental.pallas import tpu as pltpu


def _make_temporal_kernel(time_steps: int):
    """Build the kernel body with the (static) number of time-of-day slots closed over."""

    def kernel(vals_ref, table_ref, out_ref):
        # vals_ref:  (2, NT)  f32   row 0 = time-of-day fraction, row 1 = weekday id
        # table_ref: (F, Kp)  f32   [time_day; time_week]^T, K padded to a multiple of 8
        # out_ref:   (F, NT)  f32   NT is a multiple of 128 -> unmasked lane-dense stores
        k_pad = table_ref.shape[1]
        nt = vals_ref.shape[1]

        day = vals_ref[0:1, :]                                          # (1, NT)
        week = vals_ref[1:2, :]                                         # (1, NT)

        # Same semantics as the PyTorch module: trunc-toward-zero (.long()) + clamp.
        day_idx = jnp.clip((day * time_steps).astype(jnp.int32),
                           0, time_steps - 1)                           # (1, NT) in [0, TIME)
        week_idx = jnp.clip(week.astype(jnp.int32), 0, 6) + time_steps  # (1, NT) in [TIME, TIME+7)

        # One compare per (Kp, NT) element: the row-range mask (k_iota < TIME) is a
        # compile-time constant, so sel is just a per-row select of day_idx vs week_idx.
        k_iota = lax.broadcasted_iota(jnp.int32, (k_pad, nt), 0)        # (Kp, NT)
        sel = jnp.where(k_iota < time_steps, day_idx, week_idx)         # (Kp, NT)
        indicator = (k_iota == sel).astype(jnp.float32)                 # two 1s per column

        # Single fused gather-as-matmul: (F, Kp) x (Kp, NT) -> (F, NT) on the MXU; the
        # day+week add happens for free in the f32 accumulator.
        out_ref[...] = jnp.dot(table_ref[...], indicator,
                               preferred_element_type=jnp.float32)

    return kernel


def prep_temporal_table(time_day, time_week):
    """One-time table prep: stack, transpose to (F, K), pad K to a multiple of 8."""
    TIME, F = time_day.shape
    K = TIME + 7
    table = jnp.concatenate([time_day, time_week], axis=0).astype(jnp.float32)  # (K, F)
    table_t = jnp.transpose(table)                                               # (F, K)
    k_pad = ((K + 7) // 8) * 8
    if k_pad != K:
        table_t = jnp.pad(table_t, ((0, 0), (0, k_pad - K)))            # zero rows never hit
    return table_t


def _pick_tile(n: int, n_tile):
    """Lane-dense tile choice: one big tile per row when it fits, else 2048-wide tiles."""
    n_pad128 = ((n + 127) // 128) * 128
    if n_tile is None:
        n_tile = n_pad128 if n_pad128 <= 2048 else 2048
    n_pad = ((n + n_tile - 1) // n_tile) * n_tile
    return n_tile, n_pad


def _temporal_embedding_impl(x, table_t, time_steps, *, n_tile=None):
    """x: (B, T, N, C); table_t: (F, k_pad) prepped. Returns (B, F, N, 1) float32."""
    B, T, N, C = x.shape
    F, k_pad = table_t.shape

    # Last-timestep day/week channels packed into one (B, 2, N) stream.
    day_vals = x[:, -1, :, 1].astype(jnp.float32)                       # (B, N)
    week_vals = x[:, -1, :, 2].astype(jnp.float32)                      # (B, N)
    vals = jnp.stack([day_vals, week_vals], axis=1)                     # (B, 2, N)

    n_tile, n_pad = _pick_tile(N, n_tile)
    if n_pad != N:
        # Zero padding -> valid (clamped) indices; padded columns are sliced off below.
        vals = jnp.pad(vals, ((0, 0), (0, 0), (0, n_pad - N)))
    num_tiles = n_pad // n_tile

    cost = pl.CostEstimate(
        flops=2 * F * k_pad * B * n_pad,
        transcendentals=0,
        bytes_accessed=(B * 2 * n_pad + F * k_pad + B * F * n_pad) * 4)

    out = pl.pallas_call(
        _make_temporal_kernel(time_steps),
        out_shape=jax.ShapeDtypeStruct((B, F, n_pad), jnp.float32),
        grid_spec=pltpu.PrefetchScalarGridSpec(
            num_scalar_prefetch=0,
            grid=(B, num_tiles),
            in_specs=[
                # packed day/week values, per-batch-row column tile
                pl.BlockSpec((pl.Squeezed(), 2, n_tile), lambda b, i: (b, 0, i)),
                # full fused table, resident across the whole grid
                pl.BlockSpec((F, k_pad), lambda b, i: (0, 0)),
            ],
            # output written directly in final (B, F, N) layout, lane-dense tiles
            out_specs=pl.BlockSpec((pl.Squeezed(), F, n_tile), lambda b, i: (b, 0, i)),
        ),
        compiler_params=pltpu.CompilerParams(
            dimension_semantics=("parallel", "parallel")),              # shards across TCs on v7x
        cost_estimate=cost,
    )(vals, table_t)

    return out[:, :, :N][..., None]                                     # (B, F, N, 1)


def make_temporal_embedding(time_day, time_week, *, n_tile=None):
    """Init-time factory: preps the fused table ONCE and returns a jitted forward."""
    TIME, _ = time_day.shape
    table_t = prep_temporal_table(time_day, time_week)

    @jax.jit
    def forward(x):
        return _temporal_embedding_impl(x, table_t, TIME, n_tile=n_tile)

    return forward


def temporal_embedding(x, time_day, time_week, *, n_tile=None):
    """Convenience one-shot call (preps the table per call; prefer make_temporal_embedding)."""
    TIME, _ = time_day.shape
    table_t = prep_temporal_table(time_day, time_week)
    return _temporal_embedding_impl(x, table_t, TIME, n_tile=n_tile)


def _reference(x, time_day, time_week):
    """Pure-JAX reference mirroring the PyTorch forward."""
    TIME = time_day.shape[0]
    day_emb = x[..., 1]
    day_idx = jnp.clip((day_emb[:, -1, :] * TIME).astype(jnp.int32), 0, TIME - 1)
    td = jnp.take(time_day, day_idx, axis=0)                            # (B, N, F)
    td = jnp.transpose(td, (0, 2, 1))[..., None]
    week_emb = x[..., 2]
    week_idx = jnp.clip(week_emb[:, -1, :].astype(jnp.int32), 0, 6)
    tw = jnp.take(time_week, week_idx, axis=0)
    tw = jnp.transpose(tw, (0, 2, 1))[..., None]
    return td + tw


if __name__ == "__main__":
    # small shapes consistent with the module's forward
    B, T, N, C = 2, 8, 16, 3
    TIME, F = 48, 32

    key = jax.random.PRNGKey(0)
    k_day, k_week, k_x1, k_x2, k_x0 = jax.random.split(key, 5)

    # deterministic xavier_uniform-style init (same distribution as nn.init.xavier_uniform_)
    bound_day = (6.0 / (TIME + F)) ** 0.5
    time_day = jax.random.uniform(k_day, (TIME, F), jnp.float32,
                                  minval=-bound_day, maxval=bound_day)
    bound_week = (6.0 / (7 + F)) ** 0.5
    time_week = jax.random.uniform(k_week, (7, F), jnp.float32,
                                   minval=-bound_week, maxval=bound_week)

    # inputs: channel 0 arbitrary signal, channel 1 in [0,1) (time-of-day), channel 2 in {0..6}
    ch0 = jax.random.normal(k_x0, (B, T, N), jnp.float32)
    ch1 = jax.random.uniform(k_x1, (B, T, N), jnp.float32)
    ch2 = jax.random.randint(k_x2, (B, T, N), 0, 7).astype(jnp.float32)
    x = jnp.stack([ch0, ch1, ch2], axis=-1)                             # (B, T, N, C)

    fwd = make_temporal_embedding(time_day, time_week)                  # table prep hoisted
    out = fwd(x)
    out = jax.block_until_ready(out)

    ref = _reference(x, time_day, time_week)
    assert out.shape == (B, F, N, 1), out.shape
    assert jnp.allclose(out, ref, atol=1e-5, rtol=1e-5), "mismatch vs reference"

    print("KERNEL_OK")
</pallas_src>

<mosaic_0001>
module attributes {stable_mosaic.version = 11 : i64} {
  func.func @kernel(%arg0: i32, %arg1: i32, %arg2: memref<1x2x128xf32, #tpu.memory_space<vmem>>, %arg3: memref<32x56xf32, #tpu.memory_space<vmem>>, %arg4: memref<1x32x128xf32, #tpu.memory_space<vmem>>) attributes {dimension_semantics = [#tpu.dimension_semantics<parallel>, #tpu.dimension_semantics<parallel>], iteration_bounds = array<i64: 2, 1>, scalar_prefetch = 0 : i64, scratch_operands = 0 : i64, tpu.core_type = #tpu.core_type<tc>, window_params = [{transform_indices = @transform_0, window_bounds = array<i64: 1, 2, 128>}, {pipeline_mode = #tpu.pipeline_mode<synchronous>, transform_indices = @transform_1, window_bounds = array<i64: 32, 56>}, {transform_indices = @transform_2, window_bounds = array<i64: 1, 32, 128>}]} {
    %c0 = arith.constant 0 : index
    %c0_0 = arith.constant 0 : index
    %c0_1 = arith.constant 0 : index
    %0 = vector.load %arg2[%c0, %c0_0, %c0_1] : memref<1x2x128xf32, #tpu.memory_space<vmem>>, vector<1x1x128xf32>
    %1 = vector.shape_cast %0 : vector<1x1x128xf32> to vector<1x128xf32>
    %c0_2 = arith.constant 0 : index
    %c1 = arith.constant 1 : index
    %c0_3 = arith.constant 0 : index
    %2 = vector.load %arg2[%c0_2, %c1, %c0_3] : memref<1x2x128xf32, #tpu.memory_space<vmem>>, vector<1x1x128xf32>
    %3 = vector.shape_cast %2 : vector<1x1x128xf32> to vector<1x128xf32>
    %cst = arith.constant 4.800000e+01 : f32
    %4 = vector.broadcast %cst : f32 to vector<1x128xf32>
    %5 = arith.mulf %1, %4 : vector<1x128xf32>
    %6 = arith.fptosi %5 : vector<1x128xf32> to vector<1x128xi32>
    %c0_i32 = arith.constant 0 : i32
    %c47_i32 = arith.constant 47 : i32
    %7 = vector.broadcast %c0_i32 : i32 to vector<1x128xi32>
    %8 = arith.maxsi %7, %6 : vector<1x128xi32>
    %9 = vector.broadcast %c47_i32 : i32 to vector<1x128xi32>
    %10 = arith.minsi %9, %8 : vector<1x128xi32>
    %11 = arith.fptosi %3 : vector<1x128xf32> to vector<1x128xi32>
    %c0_i32_4 = arith.constant 0 : i32
    %c6_i32 = arith.constant 6 : i32
    %12 = vector.broadcast %c0_i32_4 : i32 to vector<1x128xi32>
    %13 = arith.maxsi %12, %11 : vector<1x128xi32>
    %14 = vector.broadcast %c6_i32 : i32 to vector<1x128xi32>
    %15 = arith.minsi %14, %13 : vector<1x128xi32>
    %c48_i32 = arith.constant 48 : i32
    %16 = vector.broadcast %c48_i32 : i32 to vector<1x128xi32>
    %17 = arith.addi %15, %16 : vector<1x128xi32>
    %18 = tpu.iota {dimensions = array<i32: 0>} : vector<56x128xi32>
    %c48_i32_5 = arith.constant 48 : i32
    %19 = vector.broadcast %c48_i32_5 : i32 to vector<56x128xi32>
    %20 = arith.cmpi slt, %18, %19 : vector<56x128xi32>
    %21 = vector.shape_cast %10 : vector<1x128xi32> to vector<1x128xi32>
    %22 = vector.broadcast %21 : vector<1x128xi32> to vector<56x128xi32>
    %23 = vector.shape_cast %17 : vector<1x128xi32> to vector<1x128xi32>
    %24 = vector.broadcast %23 : vector<1x128xi32> to vector<56x128xi32>
    %25 = arith.select %20, %22, %24 : vector<56x128xi1>, vector<56x128xi32>
    %26 = arith.cmpi eq, %18, %25 : vector<56x128xi32>
    %27 = arith.extui %26 : vector<56x128xi1> to vector<56x128xi32>
    %28 = arith.sitofp %27 : vector<56x128xi32> to vector<56x128xf32>
    %c0_6 = arith.constant 0 : index
    %c0_7 = arith.constant 0 : index
    %29 = vector.load %arg3[%c0_6, %c0_7] : memref<32x56xf32, #tpu.memory_space<vmem>>, vector<32x56xf32>
    %cst_8 = arith.constant dense<0.000000e+00> : vector<32x128xf32>
    %30 = tpu.matmul %29, %28, %cst_8 {dimension_numbers = #tpu.dot_dimension_numbers<[1], [0], [0], [1], [0, 0, 1, 1], [], []>} : vector<32x56xf32>, vector<56x128xf32>, vector<32x128xf32> -> vector<32x128xf32>
    %c0_9 = arith.constant 0 : index
    %c0_10 = arith.constant 0 : index
    %c0_11 = arith.constant 0 : index
    %31 = vector.load %arg4[%c0_9, %c0_10, %c0_11] : memref<1x32x128xf32, #tpu.memory_space<vmem>>, vector<1x32x128xf32>
    %32 = vector.shape_cast %31 : vector<1x32x128xf32> to vector<32x128xf32>
    %33 = vector.shape_cast %30 : vector<32x128xf32> to vector<1x32x128xf32>
    tpu.vector_store %arg4[%c0_9, %c0_10, %c0_11], %33 {strides = array<i32>} : memref<1x32x128xf32, #tpu.memory_space<vmem>>, vector<1x32x128xf32>,
    return
  }
  func.func @transform_0(%arg0: i32, %arg1: i32) -> (i32, i32, i32) {
    %c0_i32 = arith.constant 0 : i32
    %c0_i32_0 = arith.constant 0 : i32
    return %arg0, %c0_i32, %arg1 : i32, i32, i32
  }
  func.func @transform_1(%arg0: i32, %arg1: i32) -> (i32, i32) {
    %c0_i32 = arith.constant 0 : i32
    %c0_i32_0 = arith.constant 0 : i32
    %c0_i32_1 = arith.constant 0 : i32
    return %c0_i32, %c0_i32_0 : i32, i32
  }
  func.func @transform_2(%arg0: i32, %arg1: i32) -> (i32, i32, i32) {
    %c0_i32 = arith.constant 0 : i32
    %c0_i32_0 = arith.constant 0 : i32
    return %arg0, %c0_i32, %arg1 : i32, i32, i32
  }
}

</mosaic_0001>

<bundles_post_ra>
// kernel: forward.1
= control target key start
LH: loop header
LB: loop body
LE: loop exit
PB: predicated region body
PF: predicated region fallthrough
CT: control target
= control target key end

     0   :  { %7 = vsyncpa [#allocation3], 0  ;;  %s568_s9 = smov 0   ;;  %s570_s10 = smov 0   ;;  %s613_s0 = inlined_call_operand.vmem [shape: f32[2,2,128], index: 0, kind: input, shape index: {}]   ;;  %s614_s1 = inlined_call_operand.hbm [shape: f32[32,56], index: 1, kind: input, shape index: {}]   ;;  %s615_s2 = inlined_call_operand.vmem [shape: f32[2,32,128], index: 2, kind: output, shape index: {}]  }
   0x1   :  { %s572_s11 = smov 0  }
   0x2 LB: > { %s391_s12 = sadd.s32 4294967295, %s547_s11   ;;  %s25_s13 = sadd.s32 1, %s543_s10  ;;  %s547_s11 = sphi %s572_s11, %s13_s11   ;;  %s543_s10 = sphi %s570_s10, %s617_s10   ;;  %s539_s9 = sphi %s568_s9, %s616_s9  }
   0x3   : > { %p27_p0 = scmp.ge.s32.totalorder %s25_s13, 2  ;;  %p393_p1 = scmp.ge.s32.totalorder %s547_s11, 1 }
   0x4   : > { %p107_p2 = scmp.lt.s32.totalorder %s547_s11, 3  ;;  %p461_p4 = scmp.eq.s32.totalorder %s391_s12, 0 }
   0x5   : > { %s619_s13 = smov (%p27_p0, %s25_s13), 0  ;;  %s118_s16 = sshll.u32 %s614_s1, 4  ;;  %s119_s16 = int_to_ptr.hbm [resolvable:$true] %s118_s16 }
   0x6   : > { %p108_p3 = pnand %p393_p1, %p107_p2  ;;  %s549_s17 = smov [#allocation2]  }
   0x7   : > { %s120_s18 = sshll.u32 %s549_s17, 4  ;;  %s550_s19 = smov 128   ;;  %s121_s18 = int_to_ptr.vmem [resolvable:$true] %s120_s18 }
   0x8   : > { %p457_p5 = pneg %p108_p3  ;;  %s551_s20 = smov 8  }
   0x9   : > { %146 = sbr.rel (%p108_p3) target bundleno = 182 (0xb6), region = 28 }
   0xa   : > { %p458_p6 = pnand %p461_p4, %p457_p5 }
   0xc   : > { %460 = dma.hbm_to_vmem [thread:$0]  (!%p458_p6), %s119_s16, 512, %s121_s18, [#allocation3], %s550_s19, %s550_s19, %s551_s20  }
   0xe   : > { %534 = dma.done.wait (%p461_p4), [#allocation3], 512  }
   0xf   : > { %536 = vsyncadd (%p461_p4), [#allocation3], 4294966784  ;;  %p174_p7 = scmp.lt.s32.totalorder %s539_s9, 1  ;;  %v203_v5 = vlaneseq  ;;  %v552_v24 = vmov 1.0   ;;  %v250_v27 = vld [vmem:[#allocation2 + $0x10] sm:$0xff]  ;;  %vm252_vm13 = vcmask 457728  }
  0x10   : > { %v251_v28 = vld [vmem:[#allocation2 + $0x18] sm:$0xff]  ;;  %v248_v29 = vld [vmem:[#allocation2] sm:$0xff]  ;;  %v249_v30 = vld [vmem:[#allocation2 + $0x8] sm:$0xff] }
  0x11   : > { %s621_s9 = smov (!%p174_p7, %s539_s9), 1  ;;  %v204_v12 = vshrl.u32 %v203_v5, 7 }
  0x12   : > { %s398_s21 = sshll.u32 %s621_s9, 1  ;;  %s421_s25 = sshll.u32 %s621_s9, 5 }
  0x13   : > { %s180_s24 = scalar_lea.vmem %s613_s0, %s398_s21  ;;  %v210_v17 = vadd.s32 48, %v204_v12  ;;  %v209_v18 = vadd.s32 40, %v204_v12  ;;  %v208_v22 = vadd.s32 32, %v204_v12  ;;  %v207_v23 = vadd.s32 24, %v204_v12  ;;  %s188_s28 = scalar_lea.vmem %s615_s2, %s421_s25 }
  0x14   : > { %v189_v0 = vld [vmem:[%s180_s24] sm:$0x1]  ;;  %v190_v1 = vld [vmem:[%s180_s24 + $0x1] sm:$0x1]  ;;  %v206_v25 = vadd.s32 16, %v204_v12  ;;  %v205_v26 = vadd.s32 8, %v204_v12 }
  0x15   : > { %v191_v2 = vmul.f32 48.0, %v189_v0  ;;  %vm448_vm0 = vcmp.lt.s32.totalorder %v190_v1, 0  ;;  %v449_v3 = vceil.f32 %v190_v1  ;;  %v450_v4 = vfloor.f32 %v190_v1 }
  0x17   : > { %vm443_vm1 = vcmp.lt.s32.totalorder %v191_v2, 0  ;;  %v444_v6 = vceil.f32 %v191_v2  ;;  %v445_v7 = vfloor.f32 %v191_v2  ;;  %v451_v8 = vsel %vm448_vm0, %v449_v3, %v450_v4 }
  0x18   : > { %v452_v9 = vcvt.f32.s32 %v451_v8 }
  0x19   : > { %v446_v10 = vsel %vm443_vm1, %v444_v6, %v445_v7 }
  0x1a   : > { %v447_v11 = vcvt.f32.s32 %v446_v10  ;;  %vm198_vm2 = vcmp.gt.s32.totalorder %v452_v9, 0 }
  0x1b   : > { %v199_v13 = vsel %vm198_vm2, %v452_v9, 0 }
  0x1c   : > { %vm200_vm3 = vcmp.lt.s32.totalorder %v199_v13, 6  ;;  %vm193_vm4 = vcmp.gt.s32.totalorder %v447_v11, 0 }
  0x1d   : > { %v201_v14 = vsel %vm200_vm3, %v199_v13, 6  ;;  %v194_v15 = vsel %vm193_vm4, %v447_v11, 0 }
  0x1e   : > { %v202_v16 = vadd.s32 48, %v201_v14  ;;  %vm195_vm5 = vcmp.lt.s32.totalorder %v194_v15, 47 }
  0x1f   : > { %v196_v19 = vsel %vm195_vm5, %v194_v15, 47 }
  0x20   : > { %v219_v20 = vperm.slane %v202_v16, 0  ;;  %v218_v21 = vperm.slane %v196_v19, 0 }
  0x22   : > { %vm233_vm6 = vcmp.eq.s32.totalorder %v210_v17, %v219_v20  ;;  %vm232_vm7 = vcmp.eq.s32.totalorder %v209_v18, %v218_v21  ;;  %vm231_vm8 = vcmp.eq.s32.totalorder %v208_v22, %v218_v21  ;;  %vm230_vm9 = vcmp.eq.s32.totalorder %v207_v23, %v218_v21 }
  0x23   : > { %423 = vmatpush.msk.msra.mxu2 %vm233_vm6, %v552_v24  ;;  %424 = vmatpush.msk.msra.mxu3 %vm233_vm6, %v552_v24  ;;  %vm229_vm10 = vcmp.eq.s32.totalorder %v206_v25, %v218_v21  ;;  %vm228_vm11 = vcmp.eq.s32.totalorder %v205_v26, %v218_v21  ;;  %vm227_vm12 = vcmp.eq.s32.totalorder %v204_v12, %v218_v21 }
  0x24   : > { %408 = vmatpush.msk.msra.mxu0 %vm233_vm6, %v552_v24  ;;  %422 = vmatpush.msk.msra.mxu1 %vm233_vm6, %v552_v24 }
  0x25   : > { %426 = vmatpush.msk.msra.mxu2 %vm232_vm7, %v552_v24  ;;  %427 = vmatpush.msk.msra.mxu3 %vm232_vm7, %v552_v24 }
  0x26   : > { %409 = vmatpush.msk.msra.mxu0 %vm232_vm7, %v552_v24  ;;  %425 = vmatpush.msk.msra.mxu1 %vm232_vm7, %v552_v24 }
  0x27   : > { %429 = vmatpush.msk.msra.mxu2 %vm231_vm8, %v552_v24  ;;  %430 = vmatpush.msk.msra.mxu3 %vm231_vm8, %v552_v24 }
  0x28   : > { %410 = vmatpush.msk.msra.mxu0 %vm231_vm8, %v552_v24  ;;  %428 = vmatpush.msk.msra.mxu1 %vm231_vm8, %v552_v24 }
  0x29   : > { %432 = vmatpush.msk.msra.mxu2 %vm230_vm9, %v552_v24  ;;  %433 = vmatpush.msk.msra.mxu3 %vm230_vm9, %v552_v24 }
  0x2a   : > { %411 = vmatpush.msk.msra.mxu0 %vm230_vm9, %v552_v24  ;;  %431 = vmatpush.msk.msra.mxu1 %vm230_vm9, %v552_v24 }
  0x2b   : > { %435 = vmatpush.msk.msra.mxu2 %vm229_vm10, %v552_v24  ;;  %436 = vmatpush.msk.msra.mxu3 %vm229_vm10, %v552_v24 }
  0x2c   : > { %412 = vmatpush.msk.msra.mxu0 %vm229_vm10, %v552_v24  ;;  %434 = vmatpush.msk.msra.mxu1 %vm229_vm10, %v552_v24 }
  0x2d   : > { %438 = vmatpush.msk.msra.mxu2 %vm228_vm11, %v552_v24  ;;  %439 = vmatpush.msk.msra.mxu3 %vm228_vm11, %v552_v24 }
  0x2e   : > { %413 = vmatpush.msk.msra.mxu0 %vm228_vm11, %v552_v24  ;;  %437 = vmatpush.msk.msra.mxu1 %vm228_vm11, %v552_v24 }
  0x2f   : > { %441 = vmatpush.msk.msra.mxu2 %vm227_vm12, %v552_v24  ;;  %442 = vmatpush.msk.msra.mxu3 %vm227_vm12, %v552_v24 }
  0x30   : > { %417 = vmatmul.msk.f32.vlgmr.msra.gmra.mxu2 %vm252_vm13, %v250_v27  ;;  %418 = vmatmul.msk.f32.vlgmr.msra.gmra.mxu3 %vm252_vm13, %v251_v28 }
  0x31   : > { %414 = vmatpush.msk.msra.mxu0 %vm227_vm12, %v552_v24  ;;  %440 = vmatpush.msk.msra.mxu1 %vm227_vm12, %v552_v24 }
  0x32   : > { %415 = vmatmul.msk.f32.vlgmr.msra.gmra.mxu0 %vm252_vm13, %v248_v29  ;;  %416 = vmatmul.msk.f32.vlgmr.msra.gmra.mxu1 %vm252_vm13, %v249_v30 }
  0xaf   : > { %v282_v31 = vpop.f32.mrf.mxu0  ;;  %v285_v32 = vpop.f32.mrf.mxu1 }
  0xb0   : > { %294 = vst [vmem:[%s188_s28] sm:$0xff] %v282_v31 }
  0xb1   : > { %295 = vst [vmem:[%s188_s28 + $0x8] sm:$0xff] %v285_v32 }
  0xb3   : > { %v288_v33 = vpop.f32.mrf.mxu2  ;;  %v291_v34 = vpop.f32.mrf.mxu3 }
  0xb4   : > { %296 = vst [vmem:[%s188_s28 + $0x10] sm:$0xff] %v288_v33 }
  0xb5   : > { %297 = vst [vmem:[%s188_s28 + $0x18] sm:$0xff] %v291_v34 }
  0xb6 PF: > { %s13_s11 = sadd.s32 1, %s547_s11   ;;  %s616_s9 = smov %s543_s10 }
  0xb7   : > { %p10_p8 = scmp.ge.s32.totalorder %s13_s11, 4   ;;  %s617_s10 = smov %s619_s13 }
  0xb9   :  { %12 = sbr.rel (!%p10_p8) target bundleno = 2 (0x2), region = 63 }
  0xbe   :  { %325 = vsyncpa [#allocation3], 1 }
  0xbf   :  { %327 = vsyncpa [#allocation3 + $0x1], 1 }

</bundles_post_ra>
